<compile_context>
chip_gen: v6e
topology: v6e:2x2x1
jax: 0.10.0
libtpu: 0.0.40
codegen_flags: <defaults>
</compile_context>

<pallas_src>
import jax
import jax.numpy as jnp
from jax.experimental import pallas as pl
from jax.experimental.pallas import tpu as pltpu

# ---------------- problem sizes (small, TPU-friendly) -------------------------
NODE_SIZE = 128     # node_size
NODE_HIDDEN = 128   # node_hidden
REL_SIZE = 16       # rel_size (unused by the reproduced forward path)
REL_HIDDEN = 128    # rel_hidden (unused by the reproduced forward path)
N_PAIRS = 8         # number of training pairs
GAMMA = 3.0
LAMB = 30.0
TAU = 10.0


# ============================ fused Pallas kernel =============================

def _fused_encoder_kernel(pairs_ref,            # SMEM  [P, 2] int32 (scalar prefetch)
                          adj_ref,              # VMEM  [N, N] f32 (row-softmaxed adjacency, dense)
                          emb_ref,              # VMEM  [N, D] f32 (entity embedding table)
                          out_ref,              # VMEM  [1, 1] f32 (mean align loss)
                          feat_ref):            # VMEM  [N, D] f32 scratch (GCN feature)
    n_pairs = pairs_ref.shape[0]
    n_nodes, _ = feat_ref.shape

    # ---- 1) GCN neighbor-average: dense row-softmaxed adjacency @ embeddings.
    feat_ref[...] = jnp.dot(adj_ref[...], emb_ref[...],
                            preferred_element_type=jnp.float32)
    feat = feat_ref[...]                                           # [N, D]
    # TODO(synk): MR_Graph (e_encoder) has no reference implementation; identity.
    # dropout(rate=0.0) -> identity.

    # ---- 2) Build per-pair one-hot selectors + loss mask from SMEM indices.
    col = jax.lax.broadcasted_iota(jnp.int32, (1, n_nodes), 1)     # [1, N]
    l_rows, r_rows, mask_rows = [], [], []
    for p in range(n_pairs):                                       # unrolled, P=8
        l_p = pairs_ref[p, 0]
        r_p = pairs_ref[p, 1]
        oh_l = (col == l_p).astype(jnp.float32)                    # [1, N]
        oh_r = (col == r_p).astype(jnp.float32)                    # [1, N]
        l_rows.append(oh_l)
        r_rows.append(oh_r)
        mask_rows.append(1.0 - oh_l - oh_r)                        # matches 1-onehot(l)-onehot(r)
    sel = jnp.concatenate(l_rows + r_rows, axis=0)                 # [2P, N]
    mask = jnp.concatenate(mask_rows + mask_rows, axis=0)          # [2P, N]

    # ---- 3) Gather l/r embeddings with one MXU push: [2P,N] @ [N,D].
    lr_emb = jnp.dot(sel, feat, preferred_element_type=jnp.float32)  # [2P, D]
    l_emb = lr_emb[:n_pairs, :]                                    # [P, D]
    r_emb = lr_emb[n_pairs:, :]                                    # [P, D]

    # pos_dis = sum((l - r)^2, -1, keepdim)   (shared by both branches)
    pos = jnp.sum(jnp.square(l_emb - r_emb), axis=-1, keepdims=True)   # [P, 1]
    pos2 = jnp.concatenate([pos, pos], axis=0)                         # [2P, 1]

    # ---- 4) squared_dist to every node, both branches in ONE matmul.
    emb_norms = jnp.sum(jnp.square(feat), axis=-1)[None, :]            # [1, N]
    a_norms = jnp.sum(jnp.square(lr_emb), axis=-1, keepdims=True)      # [2P, 1]
    cross = jax.lax.dot_general(lr_emb, feat, (((1,), (1,)), ((), ())),
                                preferred_element_type=jnp.float32)    # [2P, N]
    neg = a_norms + emb_norms - 2.0 * cross                            # [2P, N]

    loss = (pos2 - neg + GAMMA) * mask                                 # [2P, N]

    # ---- 5) per-row standardization (population std, unbiased=False) + LSE.
    mean = jnp.mean(loss, axis=-1, keepdims=True)                      # [2P, 1]
    centered = loss - mean
    var = jnp.mean(jnp.square(centered), axis=-1, keepdims=True)       # [2P, 1]
    norm = centered * jax.lax.rsqrt(var)                               # (x-mean)/std

    z = LAMB * norm + TAU
    zmax = jnp.max(z, axis=-1, keepdims=True)                          # [2P, 1]
    lse = zmax + jnp.log(jnp.sum(jnp.exp(z - zmax), axis=-1,
                                 keepdims=True))                       # [2P, 1]

    # mean over pairs of (l_loss + r_loss) == sum(all 2P lse) / P
    out_ref[...] = jnp.sum(lse, axis=0, keepdims=True) / n_pairs       # [1, 1]


def encoder_forward_fused(train_pairs, adj_norm, ent_emb):
    """train_pairs: [P, 2] int32, adj_norm: [N, N] f32, ent_emb: [N, D] f32."""
    n = adj_norm.shape[0]
    d = ent_emb.shape[1]
    out = pl.pallas_call(
        _fused_encoder_kernel,
        out_shape=jax.ShapeDtypeStruct((1, 1), jnp.float32),
        grid_spec=pltpu.PrefetchScalarGridSpec(
            num_scalar_prefetch=1,
            grid=(1,),
            in_specs=[pl.BlockSpec((n, n), lambda i, pairs: (0, 0)),
                      pl.BlockSpec((n, d), lambda i, pairs: (0, 0))],
            out_specs=pl.BlockSpec((1, 1), lambda i, pairs: (0, 0)),
            scratch_shapes=[pltpu.VMEM((n, d), jnp.float32)]),
        compiler_params=pltpu.CompilerParams(
            dimension_semantics=("arbitrary",)),
    )(train_pairs, adj_norm, ent_emb)
    return out[0, 0]


# ============================ glue / model ====================================

def xavier_uniform(key, shape):
    fan_in, fan_out = shape[0], shape[1]
    a = jnp.sqrt(6.0 / (fan_in + fan_out))
    return jax.random.uniform(key, shape, jnp.float32, -a, a)


def build_row_softmax_dense(indices, node_size):
    """Dense materialization of torch.sparse.softmax(coo(ones), dim=1).

    Each stored entry of row i gets value 1/nnz(row i); duplicates accumulate
    exactly as torch.sparse.mm would. Built ONCE at model construction time.
    """
    row, col = indices[0], indices[1]
    row_counts = jax.ops.segment_sum(
        jnp.ones_like(row, dtype=jnp.float32), row, num_segments=node_size)
    vals = 1.0 / row_counts[row]
    dense = jnp.zeros((node_size, node_size), jnp.float32).at[row, col].add(vals)
    return dense


class EncoderModelPallas:
    def __init__(self, key, node_hidden, rel_hidden, node_size, rel_size,
                 ent_adj, gamma=GAMMA):
        self.node_size = node_size
        self.node_hidden = node_hidden
        self.gamma = gamma
        k_ent, k_rel = jax.random.split(key)
        self.ent_embedding = xavier_uniform(k_ent, (node_size, node_hidden))
        self.rel_embedding = xavier_uniform(k_rel, (rel_size, rel_hidden))
        # Static per model -> cached dense row-softmaxed adjacency (64 KB).
        self.adj_norm = jax.block_until_ready(
            build_row_softmax_dense(ent_adj, node_size))
        # NOTE: e_encoder / r_encoder (MR_Graph) and LSMGCN parameters are not
        # constructible -- class definitions are not in the provided reference.

    def forward(self, train_pairs):
        # Whole forward path (GCN avg + align loss + mean) runs in one fused
        # Pallas kernel; pair indices ride in via scalar prefetch (SMEM).
        return encoder_forward_fused(train_pairs.astype(jnp.int32),
                                     self.adj_norm, self.ent_embedding)


# ================================ main ========================================

if __name__ == "__main__":
    key = jax.random.PRNGKey(0)
    k_model, k_src, k_dst, k_pl, k_pr = jax.random.split(key, 5)

    # synthetic entity adjacency: self-loops + random edges  -> [2, E]
    n_rand_edges = 4 * NODE_SIZE
    src = jax.random.randint(k_src, (n_rand_edges,), 0, NODE_SIZE)
    dst = jax.random.randint(k_dst, (n_rand_edges,), 0, NODE_SIZE)
    self_loops = jnp.arange(NODE_SIZE)
    ent_adj = jnp.stack(
        [jnp.concatenate([self_loops, src]),
         jnp.concatenate([self_loops, dst])], axis=0).astype(jnp.int32)

    model = EncoderModelPallas(k_model,
                               node_hidden=NODE_HIDDEN,
                               rel_hidden=REL_HIDDEN,
                               node_size=NODE_SIZE,
                               rel_size=REL_SIZE,
                               ent_adj=ent_adj)

    train_pairs = jnp.stack(
        [jax.random.randint(k_pl, (N_PAIRS,), 0, NODE_SIZE),
         jax.random.randint(k_pr, (N_PAIRS,), 0, NODE_SIZE)],
        axis=1).astype(jnp.int32)                                # [P, 2]

    loss = jax.jit(model.forward)(train_pairs)
    jax.block_until_ready(loss)
    assert loss.shape == () and bool(jnp.isfinite(loss))
    print("KERNEL_OK")
</pallas_src>

<mosaic_0001>
module attributes {stable_mosaic.version = 11 : i64} {
  func.func @_fused_encoder_kernel(%arg0: i32, %arg1: memref<8x2xi32, #tpu.memory_space<smem>>, %arg2: memref<128x128xf32, #tpu.memory_space<vmem>>, %arg3: memref<128x128xf32, #tpu.memory_space<vmem>>, %arg4: memref<1x1xf32, #tpu.memory_space<vmem>>, %arg5: memref<128x128xf32, #tpu.memory_space<vmem>>) attributes {dimension_semantics = [#tpu.dimension_semantics<arbitrary>], iteration_bounds = array<i64: 1>, scalar_prefetch = 1 : i64, scratch_operands = 1 : i64, tpu.core_type = #tpu.core_type<tc>, window_params = [{pipeline_mode = #tpu.pipeline_mode<synchronous>, transform_indices = @transform_0, window_bounds = array<i64: 128, 128>}, {pipeline_mode = #tpu.pipeline_mode<synchronous>, transform_indices = @transform_1, window_bounds = array<i64: 128, 128>}, {pipeline_mode = #tpu.pipeline_mode<synchronous>, transform_indices = @transform_2, window_bounds = array<i64: 1, 1>}]} {
    %c0 = arith.constant 0 : index
    %c0_0 = arith.constant 0 : index
    %0 = vector.load %arg2[%c0, %c0_0] : memref<128x128xf32, #tpu.memory_space<vmem>>, vector<128x128xf32>
    %c0_1 = arith.constant 0 : index
    %c0_2 = arith.constant 0 : index
    %1 = vector.load %arg3[%c0_1, %c0_2] : memref<128x128xf32, #tpu.memory_space<vmem>>, vector<128x128xf32>
    %cst = arith.constant dense<0.000000e+00> : vector<128x128xf32>
    %2 = tpu.matmul %0, %1, %cst {dimension_numbers = #tpu.dot_dimension_numbers<[1], [0], [0], [1], [0, 0, 1, 1], [], []>} : vector<128x128xf32>, vector<128x128xf32>, vector<128x128xf32> -> vector<128x128xf32>
    %c0_3 = arith.constant 0 : index
    %c0_4 = arith.constant 0 : index
    %3 = vector.load %arg5[%c0_3, %c0_4] : memref<128x128xf32, #tpu.memory_space<vmem>>, vector<128x128xf32>
    tpu.vector_store %arg5[%c0_3, %c0_4], %2 {strides = array<i32>} : memref<128x128xf32, #tpu.memory_space<vmem>>, vector<128x128xf32>,
    %c0_5 = arith.constant 0 : index
    %c0_6 = arith.constant 0 : index
    %4 = vector.load %arg5[%c0_5, %c0_6] : memref<128x128xf32, #tpu.memory_space<vmem>>, vector<128x128xf32>
    %5 = tpu.iota {dimensions = array<i32: 1>} : vector<1x128xi32>
    %c0_7 = arith.constant 0 : index
    %c0_8 = arith.constant 0 : index
    %6 = memref.load %arg1[%c0_7, %c0_8] : memref<8x2xi32, #tpu.memory_space<smem>>
    %c0_9 = arith.constant 0 : index
    %c1 = arith.constant 1 : index
    %7 = memref.load %arg1[%c0_9, %c1] : memref<8x2xi32, #tpu.memory_space<smem>>
    %8 = vector.broadcast %6 : i32 to vector<1x128xi32>
    %9 = arith.cmpi eq, %5, %8 : vector<1x128xi32>
    %10 = arith.extui %9 : vector<1x128xi1> to vector<1x128xi32>
    %11 = arith.sitofp %10 : vector<1x128xi32> to vector<1x128xf32>
    %12 = vector.broadcast %7 : i32 to vector<1x128xi32>
    %13 = arith.cmpi eq, %5, %12 : vector<1x128xi32>
    %14 = arith.extui %13 : vector<1x128xi1> to vector<1x128xi32>
    %15 = arith.sitofp %14 : vector<1x128xi32> to vector<1x128xf32>
    %cst_10 = arith.constant 1.000000e+00 : f32
    %16 = vector.broadcast %cst_10 : f32 to vector<1x128xf32>
    %17 = arith.subf %16, %11 : vector<1x128xf32>
    %18 = arith.subf %17, %15 : vector<1x128xf32>
    %c1_11 = arith.constant 1 : index
    %c0_12 = arith.constant 0 : index
    %19 = memref.load %arg1[%c1_11, %c0_12] : memref<8x2xi32, #tpu.memory_space<smem>>
    %c1_13 = arith.constant 1 : index
    %c1_14 = arith.constant 1 : index
    %20 = memref.load %arg1[%c1_13, %c1_14] : memref<8x2xi32, #tpu.memory_space<smem>>
    %21 = vector.broadcast %19 : i32 to vector<1x128xi32>
    %22 = arith.cmpi eq, %5, %21 : vector<1x128xi32>
    %23 = arith.extui %22 : vector<1x128xi1> to vector<1x128xi32>
    %24 = arith.sitofp %23 : vector<1x128xi32> to vector<1x128xf32>
    %25 = vector.broadcast %20 : i32 to vector<1x128xi32>
    %26 = arith.cmpi eq, %5, %25 : vector<1x128xi32>
    %27 = arith.extui %26 : vector<1x128xi1> to vector<1x128xi32>
    %28 = arith.sitofp %27 : vector<1x128xi32> to vector<1x128xf32>
    %cst_15 = arith.constant 1.000000e+00 : f32
    %29 = vector.broadcast %cst_15 : f32 to vector<1x128xf32>
    %30 = arith.subf %29, %24 : vector<1x128xf32>
    %31 = arith.subf %30, %28 : vector<1x128xf32>
    %c2 = arith.constant 2 : index
    %c0_16 = arith.constant 0 : index
    %32 = memref.load %arg1[%c2, %c0_16] : memref<8x2xi32, #tpu.memory_space<smem>>
    %c2_17 = arith.constant 2 : index
    %c1_18 = arith.constant 1 : index
    %33 = memref.load %arg1[%c2_17, %c1_18] : memref<8x2xi32, #tpu.memory_space<smem>>
    %34 = vector.broadcast %32 : i32 to vector<1x128xi32>
    %35 = arith.cmpi eq, %5, %34 : vector<1x128xi32>
    %36 = arith.extui %35 : vector<1x128xi1> to vector<1x128xi32>
    %37 = arith.sitofp %36 : vector<1x128xi32> to vector<1x128xf32>
    %38 = vector.broadcast %33 : i32 to vector<1x128xi32>
    %39 = arith.cmpi eq, %5, %38 : vector<1x128xi32>
    %40 = arith.extui %39 : vector<1x128xi1> to vector<1x128xi32>
    %41 = arith.sitofp %40 : vector<1x128xi32> to vector<1x128xf32>
    %cst_19 = arith.constant 1.000000e+00 : f32
    %42 = vector.broadcast %cst_19 : f32 to vector<1x128xf32>
    %43 = arith.subf %42, %37 : vector<1x128xf32>
    %44 = arith.subf %43, %41 : vector<1x128xf32>
    %c3 = arith.constant 3 : index
    %c0_20 = arith.constant 0 : index
    %45 = memref.load %arg1[%c3, %c0_20] : memref<8x2xi32, #tpu.memory_space<smem>>
    %c3_21 = arith.constant 3 : index
    %c1_22 = arith.constant 1 : index
    %46 = memref.load %arg1[%c3_21, %c1_22] : memref<8x2xi32, #tpu.memory_space<smem>>
    %47 = vector.broadcast %45 : i32 to vector<1x128xi32>
    %48 = arith.cmpi eq, %5, %47 : vector<1x128xi32>
    %49 = arith.extui %48 : vector<1x128xi1> to vector<1x128xi32>
    %50 = arith.sitofp %49 : vector<1x128xi32> to vector<1x128xf32>
    %51 = vector.broadcast %46 : i32 to vector<1x128xi32>
    %52 = arith.cmpi eq, %5, %51 : vector<1x128xi32>
    %53 = arith.extui %52 : vector<1x128xi1> to vector<1x128xi32>
    %54 = arith.sitofp %53 : vector<1x128xi32> to vector<1x128xf32>
    %cst_23 = arith.constant 1.000000e+00 : f32
    %55 = vector.broadcast %cst_23 : f32 to vector<1x128xf32>
    %56 = arith.subf %55, %50 : vector<1x128xf32>
    %57 = arith.subf %56, %54 : vector<1x128xf32>
    %c4 = arith.constant 4 : index
    %c0_24 = arith.constant 0 : index
    %58 = memref.load %arg1[%c4, %c0_24] : memref<8x2xi32, #tpu.memory_space<smem>>
    %c4_25 = arith.constant 4 : index
    %c1_26 = arith.constant 1 : index
    %59 = memref.load %arg1[%c4_25, %c1_26] : memref<8x2xi32, #tpu.memory_space<smem>>
    %60 = vector.broadcast %58 : i32 to vector<1x128xi32>
    %61 = arith.cmpi eq, %5, %60 : vector<1x128xi32>
    %62 = arith.extui %61 : vector<1x128xi1> to vector<1x128xi32>
    %63 = arith.sitofp %62 : vector<1x128xi32> to vector<1x128xf32>
    %64 = vector.broadcast %59 : i32 to vector<1x128xi32>
    %65 = arith.cmpi eq, %5, %64 : vector<1x128xi32>
    %66 = arith.extui %65 : vector<1x128xi1> to vector<1x128xi32>
    %67 = arith.sitofp %66 : vector<1x128xi32> to vector<1x128xf32>
    %cst_27 = arith.constant 1.000000e+00 : f32
    %68 = vector.broadcast %cst_27 : f32 to vector<1x128xf32>
    %69 = arith.subf %68, %63 : vector<1x128xf32>
    %70 = arith.subf %69, %67 : vector<1x128xf32>
    %c5 = arith.constant 5 : index
    %c0_28 = arith.constant 0 : index
    %71 = memref.load %arg1[%c5, %c0_28] : memref<8x2xi32, #tpu.memory_space<smem>>
    %c5_29 = arith.constant 5 : index
    %c1_30 = arith.constant 1 : index
    %72 = memref.load %arg1[%c5_29, %c1_30] : memref<8x2xi32, #tpu.memory_space<smem>>
    %73 = vector.broadcast %71 : i32 to vector<1x128xi32>
    %74 = arith.cmpi eq, %5, %73 : vector<1x128xi32>
    %75 = arith.extui %74 : vector<1x128xi1> to vector<1x128xi32>
    %76 = arith.sitofp %75 : vector<1x128xi32> to vector<1x128xf32>
    %77 = vector.broadcast %72 : i32 to vector<1x128xi32>
    %78 = arith.cmpi eq, %5, %77 : vector<1x128xi32>
    %79 = arith.extui %78 : vector<1x128xi1> to vector<1x128xi32>
    %80 = arith.sitofp %79 : vector<1x128xi32> to vector<1x128xf32>
    %cst_31 = arith.constant 1.000000e+00 : f32
    %81 = vector.broadcast %cst_31 : f32 to vector<1x128xf32>
    %82 = arith.subf %81, %76 : vector<1x128xf32>
    %83 = arith.subf %82, %80 : vector<1x128xf32>
    %c6 = arith.constant 6 : index
    %c0_32 = arith.constant 0 : index
    %84 = memref.load %arg1[%c6, %c0_32] : memref<8x2xi32, #tpu.memory_space<smem>>
    %c6_33 = arith.constant 6 : index
    %c1_34 = arith.constant 1 : index
    %85 = memref.load %arg1[%c6_33, %c1_34] : memref<8x2xi32, #tpu.memory_space<smem>>
    %86 = vector.broadcast %84 : i32 to vector<1x128xi32>
    %87 = arith.cmpi eq, %5, %86 : vector<1x128xi32>
    %88 = arith.extui %87 : vector<1x128xi1> to vector<1x128xi32>
    %89 = arith.sitofp %88 : vector<1x128xi32> to vector<1x128xf32>
    %90 = vector.broadcast %85 : i32 to vector<1x128xi32>
    %91 = arith.cmpi eq, %5, %90 : vector<1x128xi32>
    %92 = arith.extui %91 : vector<1x128xi1> to vector<1x128xi32>
    %93 = arith.sitofp %92 : vector<1x128xi32> to vector<1x128xf32>
    %cst_35 = arith.constant 1.000000e+00 : f32
    %94 = vector.broadcast %cst_35 : f32 to vector<1x128xf32>
    %95 = arith.subf %94, %89 : vector<1x128xf32>
    %96 = arith.subf %95, %93 : vector<1x128xf32>
    %c7 = arith.constant 7 : index
    %c0_36 = arith.constant 0 : index
    %97 = memref.load %arg1[%c7, %c0_36] : memref<8x2xi32, #tpu.memory_space<smem>>
    %c7_37 = arith.constant 7 : index
    %c1_38 = arith.constant 1 : index
    %98 = memref.load %arg1[%c7_37, %c1_38] : memref<8x2xi32, #tpu.memory_space<smem>>
    %99 = vector.broadcast %97 : i32 to vector<1x128xi32>
    %100 = arith.cmpi eq, %5, %99 : vector<1x128xi32>
    %101 = arith.extui %100 : vector<1x128xi1> to vector<1x128xi32>
    %102 = arith.sitofp %101 : vector<1x128xi32> to vector<1x128xf32>
    %103 = vector.broadcast %98 : i32 to vector<1x128xi32>
    %104 = arith.cmpi eq, %5, %103 : vector<1x128xi32>
    %105 = arith.extui %104 : vector<1x128xi1> to vector<1x128xi32>
    %106 = arith.sitofp %105 : vector<1x128xi32> to vector<1x128xf32>
    %cst_39 = arith.constant 1.000000e+00 : f32
    %107 = vector.broadcast %cst_39 : f32 to vector<1x128xf32>
    %108 = arith.subf %107, %102 : vector<1x128xf32>
    %109 = arith.subf %108, %106 : vector<1x128xf32>
    %110 = tpu.concatenate %11, %24, %37, %50, %63, %76, %89, %102, %15, %28, %41, %54, %67, %80, %93, %106 in 0 : vector<1x128xf32>, vector<1x128xf32>, vector<1x128xf32>, vector<1x128xf32>, vector<1x128xf32>, vector<1x128xf32>, vector<1x128xf32>, vector<1x128xf32>, vector<1x128xf32>, vector<1x128xf32>, vector<1x128xf32>, vector<1x128xf32>, vector<1x128xf32>, vector<1x128xf32>, vector<1x128xf32>, vector<1x128xf32> -> vector<16x128xf32>
    %111 = tpu.concatenate %18, %31, %44, %57, %70, %83, %96, %109, %18, %31, %44, %57, %70, %83, %96, %109 in 0 : vector<1x128xf32>, vector<1x128xf32>, vector<1x128xf32>, vector<1x128xf32>, vector<1x128xf32>, vector<1x128xf32>, vector<1x128xf32>, vector<1x128xf32>, vector<1x128xf32>, vector<1x128xf32>, vector<1x128xf32>, vector<1x128xf32>, vector<1x128xf32>, vector<1x128xf32>, vector<1x128xf32>, vector<1x128xf32> -> vector<16x128xf32>
    %cst_40 = arith.constant dense<0.000000e+00> : vector<16x128xf32>
    %112 = tpu.matmul %110, %4, %cst_40 {dimension_numbers = #tpu.dot_dimension_numbers<[1], [0], [0], [1], [0, 0, 1, 1], [], []>} : vector<16x128xf32>, vector<128x128xf32>, vector<16x128xf32> -> vector<16x128xf32>
    %113 = vector.extract_strided_slice %112 {offsets = [0, 0], sizes = [8, 128], strides = [1, 1]} : vector<16x128xf32> to vector<8x128xf32>
    %114 = vector.extract_strided_slice %112 {offsets = [8, 0], sizes = [8, 128], strides = [1, 1]} : vector<16x128xf32> to vector<8x128xf32>
    %115 = arith.subf %113, %114 : vector<8x128xf32>
    %116 = arith.mulf %115, %115 : vector<8x128xf32>
    %cst_41 = arith.constant dense<0.000000e+00> : vector<8xf32>
    %117 = vector.multi_reduction <add>, %116, %cst_41 [1] : vector<8x128xf32> to vector<8xf32>
    %118 = vector.shape_cast %117 : vector<8xf32> to vector<8x1xf32>
    %119 = tpu.concatenate %118, %118 in 0 : vector<8x1xf32>, vector<8x1xf32> -> vector<16x1xf32>
    %120 = arith.mulf %4, %4 : vector<128x128xf32>
    %cst_42 = arith.constant dense<0.000000e+00> : vector<128xf32>
    %121 = vector.multi_reduction <add>, %120, %cst_42 [1] : vector<128x128xf32> to vector<128xf32>
    %122 = vector.shape_cast %121 : vector<128xf32> to vector<1x128xf32>
    %123 = arith.mulf %112, %112 : vector<16x128xf32>
    %cst_43 = arith.constant dense<0.000000e+00> : vector<16xf32>
    %124 = vector.multi_reduction <add>, %123, %cst_43 [1] : vector<16x128xf32> to vector<16xf32>
    %125 = vector.shape_cast %124 : vector<16xf32> to vector<16x1xf32>
    %cst_44 = arith.constant dense<0.000000e+00> : vector<16x128xf32>
    %126 = tpu.matmul %112, %4, %cst_44 {dimension_numbers = #tpu.dot_dimension_numbers<[1], [1], [0], [0], [0, 0, 1, 0], [], []>} : vector<16x128xf32>, vector<128x128xf32>, vector<16x128xf32> -> vector<16x128xf32>
    %127 = vector.broadcast %125 : vector<16x1xf32> to vector<16x128xf32>
    %128 = vector.broadcast %122 : vector<1x128xf32> to vector<16x128xf32>
    %129 = arith.addf %127, %128 : vector<16x128xf32>
    %cst_45 = arith.constant 2.000000e+00 : f32
    %130 = vector.broadcast %cst_45 : f32 to vector<16x128xf32>
    %131 = arith.mulf %130, %126 : vector<16x128xf32>
    %132 = arith.subf %129, %131 : vector<16x128xf32>
    %133 = vector.broadcast %119 : vector<16x1xf32> to vector<16x128xf32>
    %134 = arith.subf %133, %132 : vector<16x128xf32>
    %cst_46 = arith.constant 3.000000e+00 : f32
    %135 = vector.broadcast %cst_46 : f32 to vector<16x128xf32>
    %136 = arith.addf %134, %135 : vector<16x128xf32>
    %137 = arith.mulf %136, %111 : vector<16x128xf32>
    %cst_47 = arith.constant dense<0.000000e+00> : vector<16xf32>
    %138 = vector.multi_reduction <add>, %137, %cst_47 [1] : vector<16x128xf32> to vector<16xf32>
    %139 = vector.shape_cast %138 : vector<16xf32> to vector<16x1xf32>
    %cst_48 = arith.constant 1.280000e+02 : f32
    %140 = vector.broadcast %cst_48 : f32 to vector<16x1xf32>
    %141 = arith.divf %139, %140 : vector<16x1xf32>
    %142 = vector.broadcast %141 : vector<16x1xf32> to vector<16x128xf32>
    %143 = arith.subf %137, %142 : vector<16x128xf32>
    %144 = arith.mulf %143, %143 : vector<16x128xf32>
    %cst_49 = arith.constant dense<0.000000e+00> : vector<16xf32>
    %145 = vector.multi_reduction <add>, %144, %cst_49 [1] : vector<16x128xf32> to vector<16xf32>
    %146 = vector.shape_cast %145 : vector<16xf32> to vector<16x1xf32>
    %cst_50 = arith.constant 1.280000e+02 : f32
    %147 = vector.broadcast %cst_50 : f32 to vector<16x1xf32>
    %148 = arith.divf %146, %147 : vector<16x1xf32>
    %149 = math.rsqrt %148 : vector<16x1xf32>
    %150 = vector.broadcast %149 : vector<16x1xf32> to vector<16x128xf32>
    %151 = arith.mulf %143, %150 : vector<16x128xf32>
    %cst_51 = arith.constant 3.000000e+01 : f32
    %152 = vector.broadcast %cst_51 : f32 to vector<16x128xf32>
    %153 = arith.mulf %152, %151 : vector<16x128xf32>
    %cst_52 = arith.constant 1.000000e+01 : f32
    %154 = vector.broadcast %cst_52 : f32 to vector<16x128xf32>
    %155 = arith.addf %153, %154 : vector<16x128xf32>
    %cst_53 = arith.constant dense<0xFF800000> : vector<16xf32>
    %156 = vector.multi_reduction <maximumf>, %155, %cst_53 [1] : vector<16x128xf32> to vector<16xf32>
    %157 = vector.shape_cast %156 : vector<16xf32> to vector<16x1xf32>
    %158 = vector.broadcast %157 : vector<16x1xf32> to vector<16x128xf32>
    %159 = arith.subf %155, %158 : vector<16x128xf32>
    %160 = math.exp %159 : vector<16x128xf32>
    %cst_54 = arith.constant dense<0.000000e+00> : vector<16xf32>
    %161 = vector.multi_reduction <add>, %160, %cst_54 [1] : vector<16x128xf32> to vector<16xf32>
    %162 = vector.shape_cast %161 : vector<16xf32> to vector<16x1xf32>
    %163 = math.log %162 : vector<16x1xf32>
    %164 = arith.addf %157, %163 : vector<16x1xf32>
    %cst_55 = arith.constant dense<0.000000e+00> : vector<1xf32>
    %165 = vector.multi_reduction <add>, %164, %cst_55 [0] : vector<16x1xf32> to vector<1xf32>
    %166 = vector.shape_cast %165 : vector<1xf32> to vector<1x1xf32>
    %cst_56 = arith.constant 8.000000e+00 : f32
    %167 = vector.broadcast %cst_56 : f32 to vector<1x1xf32>
    %168 = arith.divf %166, %167 : vector<1x1xf32>
    %c0_57 = arith.constant 0 : index
    %c0_58 = arith.constant 0 : index
    %169 = vector.load %arg4[%c0_57, %c0_58] : memref<1x1xf32, #tpu.memory_space<vmem>>, vector<1x1xf32>
    tpu.vector_store %arg4[%c0_57, %c0_58], %168 {strides = array<i32>} : memref<1x1xf32, #tpu.memory_space<vmem>>, vector<1x1xf32>,
    return
  }
  func.func @transform_0(%arg0: i32, %arg1: memref<8x2xi32, #tpu.memory_space<smem>>) -> (i32, i32) {
    %c0_i32 = arith.constant 0 : i32
    %c0_i32_0 = arith.constant 0 : i32
    %c0_i32_1 = arith.constant 0 : i32
    return %c0_i32, %c0_i32_0 : i32, i32
  }
  func.func @transform_1(%arg0: i32, %arg1: memref<8x2xi32, #tpu.memory_space<smem>>) -> (i32, i32) {
    %c0_i32 = arith.constant 0 : i32
    %c0_i32_0 = arith.constant 0 : i32
    %c0_i32_1 = arith.constant 0 : i32
    return %c0_i32, %c0_i32_0 : i32, i32
  }
  func.func @transform_2(%arg0: i32, %arg1: memref<8x2xi32, #tpu.memory_space<smem>>) -> (i32, i32) {
    %c0_i32 = arith.constant 0 : i32
    %c0_i32_0 = arith.constant 0 : i32
    %c0_i32_1 = arith.constant 0 : i32
    return %c0_i32, %c0_i32_0 : i32, i32
  }
}

</mosaic_0001>

<bundles_post_ra>
// kernel: forward.1
= control target key start
LH: loop header
LB: loop body
LE: loop exit
PB: predicated region body
PF: predicated region fallthrough
CT: control target
= control target key end

     0   :  { %s1473_s0 = inlined_call_operand.vmem [shape: s32[8,2], index: 0, kind: input, shape index: {}]   ;;  %s1474_s1 = inlined_call_operand.hbm [shape: f32[128,128], index: 1, kind: input, shape index: {}]   ;;  %s1475_s2 = inlined_call_operand.hbm [shape: f32[128,128], index: 2, kind: input, shape index: {}]   ;;  %s1476_s3 = inlined_call_operand.hbm [shape: f32[1,1], index: 3, kind: output, shape index: {}]  }
   0x1   :  { %s8_s14 = sshll.u32 %s1473_s0, 4  ;;  %s9_s14 = int_to_ptr.vmem [resolvable:$true] %s8_s14 }
   0x2   :  { %s1064_s15 = scalar_lea.vmem %s9_s14, 128  ;;  %p1069_p1 = scmp.lt.s32.totalorder %s9_s14, %s9_s14 }
   0x3   :  { %p1065_p0 = scmp.ne.s32.totalorder %s9_s14, %s1064_s15  ;;  %p1070_p2 = scmp.lt.s32.totalorder %s1064_s15, %s1064_s15 }
   0x5   :  { %p1071_p3 = por %p1070_p2, %p1069_p1 }
   0x7   :  { %p1072_p4 = pnand %p1071_p3, %p1065_p0 }
   0x9   :  { %1075 = shalt.err (!%p1072_p4)  }
   0xa   :  { %s1144_s16 = smov [#allocation4]  }
   0xb   :  { %11 = dma.vmem_to_smem %s9_s14, 128, %s1144_s16, [#allocation3] }
   0xc   :  { %1136 = dma.done.wait [#allocation3], 128 }
   0xd   :  { %1137 = vsyncadd [#allocation3], 4294967168 }
   0xe   :  { %13 = sfence }
   0xf   :  { %14 = vsyncpa [#allocation6], 0 }
  0x10   :  { %15 = vsyncpa [#allocation9], 0 }
  0x11   :  { %16 = vsyncpa [#allocation7], 0  ;;  %s1145_s17 = smov [#allocation5]  }
  0x12   :  { %s22_s18 = sshll.u32 %s1145_s17, 4  ;;  %s23_s18 = int_to_ptr.vmem [resolvable:$true] %s22_s18 }
  0x13   :  { %s1084_s0 = scalar_lea.vmem %s23_s18, 2048  ;;  %p1089_p6 = scmp.lt.s32.totalorder %s23_s18, %s23_s18 }
  0x14   :  { %p1085_p5 = scmp.ne.s32.totalorder %s23_s18, %s1084_s0  ;;  %p1090_p7 = scmp.lt.s32.totalorder %s1084_s0, %s1084_s0 }
  0x16   :  { %p1091_p8 = por %p1090_p7, %p1089_p6 }
  0x18   :  { %p1092_p9 = pnand %p1091_p8, %p1085_p5 }
  0x1a   :  { %1095 = shalt.err (!%p1092_p9)
}
  0x1b   :  { %s1146_s19 = smov 128   ;;  %s1147_s20 = smov 8  }
  0x1c   :  { %28 = dma.hbm_to_vmem [thread:$0]  %s1474_s1, 2048, %s23_s18, [#allocation6], %s1146_s19, %s1146_s19, %s1147_s20  }
  0x1d   :  { %s1148_s23 = smov [#allocation8]  }
  0x1e   :  { %s34_s24 = sshll.u32 %s1148_s23, 4  ;;  %s35_s24 = int_to_ptr.vmem [resolvable:$true] %s34_s24 }
  0x1f   :  { %s1104_s25 = scalar_lea.vmem %s35_s24, 2048  ;;  %p1109_p11 = scmp.lt.s32.totalorder %s35_s24, %s35_s24 }
  0x20   :  { %p1105_p10 = scmp.ne.s32.totalorder %s35_s24, %s1104_s25  ;;  %p1110_p12 = scmp.lt.s32.totalorder %s1104_s25, %s1104_s25 }
  0x22   :  { %p1111_p13 = por %p1110_p12, %p1109_p11 }
  0x24   :  { %p1112_p0 = pnand %p1111_p13, %p1105_p10 }
  0x26   :  { %1115 = shalt.err (!%p1112_p0)
}
  0x27   :  { %40 = dma.hbm_to_vmem [thread:$0]  %s1475_s2, 2048, %s35_s24, [#allocation9], %s1146_s19, %s1146_s19, %s1147_s20  }
  0x28   :  { %1138 = dma.done.wait [#allocation6], 2048  }
  0x29   :  { %1139 = vsyncadd [#allocation6], 4294965248 }
  0x2a   :  { %1140 = dma.done.wait [#allocation9], 2048  }
  0x2b   :  { %1141 = vsyncadd [#allocation9], 4294965248  ;;  %v78_v0 = vld [vmem:[#allocation8 + $0x78] sm:$0xff]  ;;  %v77_v1 = vld [vmem:[#allocation8 + $0x70] sm:$0xff]  ;;  %s258_s1 = sld [smem:[#allocation4]]  ;;  %v256_v32 = vlaneseq  ;;  %v1149_v36 = vmov 0.0  }
  0x2c   :  { %916 = vmatprep.subr.mxu1 %v78_v0  ;;  %v76_v2 = vld [vmem:[#allocation8 + $0x68] sm:$0xff]  ;;  %v75_v3 = vld [vmem:[#allocation8 + $0x60] sm:$0xff]  ;;  %v74_v5 = vld [vmem:[#allocation8 + $0x58] sm:$0xff]  ;;  %s820_s2 = sld [smem:[#allocation4 + $0x80]]  ;;  %vm354_vm2 = vcmask 1040384   ;;  %vm356_vm4 = vcmask 1041408  }
  0x2d   :  { %917 = vmatpush3.msra.mxu1 %v78_v0  ;;  %v47_v4 = vld [vmem:[#allocation5] sm:$0xff]  ;;  %v73_v6 = vld [vmem:[#allocation8 + $0x50] sm:$0xff]  ;;  %v72_v7 = vld [vmem:[#allocation8 + $0x48] sm:$0xff]  ;;  %s824_s28 = sld [smem:[#allocation4 + $0x100]]  ;;  %v1182_v33 = vand.u32 127, %v256_v32  ;;  %vm358_vm8 = vcmask 1042432  }
  0x2e   :  { %918 = vmatprep.subr.mxu1 %v77_v1  ;;  %948 = vmatprep.mubr.f32.mxu1 %v47_v4  ;;  %v71_v8 = vld [vmem:[#allocation8 + $0x40] sm:$0xff]  ;;  %v70_v9 = vld [vmem:[#allocation8 + $0x38] sm:$0xff]  ;;  %v69_v10 = vld [vmem:[#allocation8 + $0x30] sm:$0xff]  ;;  %s828_s29 = sld [smem:[#allocation4 + $0x180]]  ;;  %vm360_vm11 = vcmask 1043456   ;;  %vm362_vm12 = vcmask 1044480  }
  0x2f   :  { %919 = vmatpush3.msra.mxu1 %v77_v1  ;;  %v68_v11 = vld [vmem:[#allocation8 + $0x28] sm:$0xff]  ;;  %v67_v12 = vld [vmem:[#allocation8 + $0x20] sm:$0xff]  ;;  %v66_v13 = vld [vmem:[#allocation8 + $0x18] sm:$0xff]  ;;  %s832_s30 = sld [smem:[#allocation4 + $0x200]]  ;;  %vm364_vm13 = vcmask 1045504   ;;  %vm366_vm14 = vcmask 1046528  }
  0x30   :  { %920 = vmatprep.subr.mxu1 %v76_v2  ;;  %v65_v14 = vld [vmem:[#allocation8 + $0x10] sm:$0xff]  ;;  %v64_v15 = vld [vmem:[#allocation8 + $0x8] sm:$0xff]  ;;  %v63_v16 = vld [vmem:[#allocation8] sm:$0xff]  ;;  %s836_s4 = sld [smem:[#allocation4 + $0x280]]  ;;  %s1151_s15 = smov [#allocation10]  }
  0x31   :  { %921 = vmatpush3.msra.mxu1 %v76_v2  ;;  %v48_v17 = vld [vmem:[#allocation5 + $0x8] sm:$0xff]  ;;  %v49_v18 = vld [vmem:[#allocation5 + $0x10] sm:$0xff]  ;;  %v50_v19 = vld [vmem:[#allocation5 + $0x18] sm:$0xff]  ;;  %v260_v34 = vstv %s258_s1  ;;  %s840_s5 = sld [smem:[#allocation4 + $0x300]]  ;;  %s807_s16 = sshll.u32 %s1151_s15, 4  ;;  %s808_s16 = int_to_ptr.vmem [resolvable:$true] %s807_s16 }
  0x32   :  { %922 = vmatprep.subr.mxu1 %v75_v3  ;;  %v51_v20 = vld [vmem:[#allocation5 + $0x20] sm:$0xff]  ;;  %v52_v21 = vld [vmem:[#allocation5 + $0x28] sm:$0xff]  ;;  %v53_v22 = vld [vmem:[#allocation5 + $0x30] sm:$0xff]  ;;  %vm261_vm0 = vcmp.eq.s32.totalorder %v1182_v33, %v260_v34  ;;  %v272_v35 = vstv %s820_s2  ;;  %s844_s6 = sld [smem:[#allocation4 + $0x380]]  ;;  %s1116_s17 = scalar_lea.vmem %s808_s16, 16 }
  0x33   :  { %923 = vmatpush3.msra.mxu1 %v75_v3  ;;  %v54_v23 = vld [vmem:[#allocation5 + $0x38] sm:$0xff]  ;;  %v55_v24 = vld [vmem:[#allocation5 + $0x40] sm:$0xff]  ;;  %v56_v25 = vld [vmem:[#allocation5 + $0x48] sm:$0xff]  ;;  %v1186_v37 = vsel %vm261_vm0, 1.0, %v1149_v36  ;;  %vm273_vm1 = vcmp.eq.s32.totalorder %v1182_v33, %v272_v35  ;;  %v284_v38 = vstv %s824_s28  ;;  %s817_s7 = sld [smem:[#allocation4 + $0x1]]  ;;  %p1117_p1 = scmp.ne.s32.totalorder %s808_s16, %s1116_s17 }
  0x34   :  { %924 = vmatprep.subr.mxu1 %v74_v5  ;;  %v57_v26 = vld [vmem:[#allocation5 + $0x50] sm:$0xff]  ;;  %v58_v27 = vld [vmem:[#allocation5 + $0x58] sm:$0xff]  ;;  %v59_v28 = vld [vmem:[#allocation5 + $0x60] sm:$0xff]  ;;  %v1190_v39 = vsel %vm273_vm1, 1.0, %v1149_v36  ;;  %vm285_vm3 = vcmp.eq.s32.totalorder %v1182_v33, %v284_v38  ;;  %v296_v40 = vstv %s828_s29  ;;  %s821_s8 = sld [smem:[#allocation4 + $0x81]]  ;;  %s1120_s18 = scalar_lea.vmem %s808_s16, 32 }
  0x35   :  { %925 = vmatpush3.msra.mxu1 %v74_v5  ;;  %v60_v29 = vld [vmem:[#allocation5 + $0x68] sm:$0xff]  ;;  %v61_v30 = vld [vmem:[#allocation5 + $0x70] sm:$0xff]  ;;  %v62_v31 = vld [vmem:[#allocation5 + $0x78] sm:$0xff]  ;;  %v1194_v41 = vsel %vm285_vm3, 1.0, %v1149_v36  ;;  %vm297_vm5 = vcmp.eq.s32.totalorder %v1182_v33, %v296_v40  ;;  %v308_v42 = vstv %s832_s30  ;;  %v355_v43 = vsel %vm354_vm2, %v1186_v37, %v1190_v39  ;;  %s1269_s9 = sld [smem:[#allocation4 + $0x101]]  ;;  %p1121_p2 = scmp.lt.s32.totalorder %s808_s16, %s808_s16 }
  0x36   :  { %926 = vmatprep.subr.mxu1 %v73_v6  ;;  %v1201_v44 = vsel %vm297_vm5, 1.0, %v1149_v36  ;;  %vm309_vm6 = vcmp.eq.s32.totalorder %v1182_v33, %v308_v42  ;;  %v320_v45 = vstv %s836_s4  ;;  %v357_v46 = vsel %vm356_vm4, %v355_v43, %v1194_v41  ;;  %s1274_s10 = sld [smem:[#allocation4 + $0x181]]  ;;  %p1122_p3 = scmp.lt.s32.totalorder %s1120_s18, %s1116_s17 }
  0x37   :  { %927 = vmatpush3.msra.mxu1 %v73_v6  ;;  %vm321_vm7 = vcmp.eq.s32.totalorder %v1182_v33, %v320_v45  ;;  %v332_v47 = vstv %s840_s5  ;;  %v1209_v49 = vsel %vm309_vm6, 1.0, %v1149_v36  ;;  %v359_v50 = vsel %vm358_vm8, %v357_v46, %v1201_v44  ;;  %s1279_s11 = sld [smem:[#allocation4 + $0x201]] }
  0x38   :  { %928 = vmatprep.subr.mxu1 %v72_v7  ;;  %vm333_vm9 = vcmp.eq.s32.totalorder %v1182_v33, %v332_v47  ;;  %v344_v48 = vstv %s844_s6  ;;  %v1215_v51 = vsel %vm321_vm7, 1.0, %v1149_v36  ;;  %v361_v54 = vsel %vm360_vm11, %v359_v50, %v1209_v49  ;;  %s1286_s12 = sld [smem:[#allocation4 + $0x281]]  ;;  %p1123_p4 = por %p1122_p3, %p1121_p2 }
  0x39   :  { %929 = vmatpush3.msra.mxu1 %v72_v7  ;;  %vm345_vm10 = vcmp.eq.s32.totalorder %v1182_v33, %v344_v48  ;;  %v1218_v52 = vsel %vm333_vm9, 1.0, %v1149_v36  ;;  %v363_v55 = vsel %vm362_vm12, %v361_v54, %v1215_v51  ;;  %s1299_s13 = sld [smem:[#allocation4 + $0x301]] }
  0x3a   :  { %930 = vmatprep.subr.mxu1 %v71_v8  ;;  %v1221_v53 = vsel %vm345_vm10, 1.0, %v1149_v36  ;;  %v365_v56 = vsel %vm364_vm13, %v363_v55, %v1218_v52  ;;  %s1313_s14 = sld [smem:[#allocation4 + $0x381]]  ;;  %vm636_vm10 = vcmask 326912   ;;  %p1124_p5 = pnand %p1123_p4, %p1117_p1 }
  0x3b   :  { %931 = vmatpush3.msra.mxu1 %v71_v8  ;;  %v367_v57 = vsel %vm366_vm14, %v365_v56, %v1221_v53 }
  0x3c   :  { %932 = vmatprep.subr.mxu1 %v70_v9 }
  0x3d   :  { %933 = vmatpush3.msra.mxu1 %v70_v9 }
  0x3e   :  { %934 = vmatprep.subr.mxu1 %v69_v10 }
  0x3f   :  { %935 = vmatpush3.msra.mxu1 %v69_v10 }
  0x40   :  { %936 = vmatprep.subr.mxu1 %v68_v11  ;;  %v348_v38 = vstv %s1313_s14 }
  0x41   :  { %937 = vmatpush3.msra.mxu1 %v68_v11  ;;  %vm349_vm9 = vcmp.eq.s32.totalorder %v1182_v33, %v348_v38 }
  0x42   :  { %938 = vmatprep.subr.mxu1 %v67_v12  ;;  %v1363_v45 = vsel %vm349_vm9, 1.0, %v1149_v36  ;;  %vm799_vm9 = vcmask 0  }
  0x43   :  { %939 = vmatpush3.msra.mxu1 %v67_v12 }
  0x44   :  { %940 = vmatprep.subr.mxu1 %v66_v13 }
  0x45   :  { %941 = vmatpush3.msra.mxu1 %v66_v13 }
  0x46   :  { %942 = vmatprep.subr.mxu1 %v65_v14 }
  0x47   :  { %943 = vmatpush3.msra.mxu1 %v65_v14 }
  0x48   :  { %944 = vmatprep.subr.mxu1 %v64_v15 }
  0x49   :  { %945 = vmatpush3.msra.mxu1 %v64_v15 }
  0x4a   :  { %946 = vmatprep.subr.mxu1 %v63_v16 }
  0x4b   :  { %947 = vmatpush3.msra.mxu1 %v63_v16 }
  0x4c   :  { %949 = vmatmul.mubr.f32.vlgmr.msra.gmra.mxu1 %v48_v17 }
  0x4d   :  { %951 = vmatprep.mubr.f32.mxu1 %v49_v18  ;;  %v264_v18 = vstv %s817_s7 }
  0x4e   :  { %vm265_vm15 = vcmp.eq.s32.totalorder %v1182_v33, %v264_v18 }
  0x50   :  { %952 = vmatmul.mubr.f32.gmra.mxu1 %v50_v19  ;;  %v276_v19 = vstv %s821_s8 }
  0x51   :  { %954 = vmatprep.mubr.f32.mxu1 %v51_v20  ;;  %vm277_vm0 = vcmp.eq.s32.totalorder %v1182_v33, %v276_v19  ;;  %v288_v20 = vstv %s1269_s9 }
  0x52   :  { %vm289_vm1 = vcmp.eq.s32.totalorder %v1182_v33, %v288_v20 }
  0x54   :  { %955 = vmatmul.mubr.f32.gmra.mxu1 %v52_v21  ;;  %v1291_v21 = vsel %vm265_vm15, 1.0, %v1149_v36  ;;  %vm671_vm15 = vcmask 654912  }
  0x55   :  { %957 = vmatprep.mubr.f32.mxu1 %v53_v22  ;;  %v1294_v22 = vsel %vm277_vm0, 1.0, %v1149_v36  ;;  %vm678_vm0 = vcmask 720512  }
  0x58   :  { %958 = vmatmul.mubr.f32.gmra.mxu1 %v54_v23  ;;  %v300_v23 = vstv %s1274_s10 }
  0x59   :  { %960 = vmatprep.mubr.f32.mxu1 %v55_v24  ;;  %v1305_v24 = vsel %vm289_vm1, 1.0, %v1149_v36  ;;  %vm301_vm3 = vcmp.eq.s32.totalorder %v1182_v33, %v300_v23  ;;  %v610_v23 = vadd.s32 4294967288, %v1182_v33  ;;  %vm685_vm1 = vcmask 786112  }
  0x5c   :  { %961 = vmatmul.mubr.f32.gmra.mxu1 %v56_v25  ;;  %v312_v25 = vstv %s1279_s11 }
  0x5d   :  { %963 = vmatprep.mubr.f32.mxu1 %v57_v26  ;;  %v368_v26 = vsel %vm354_vm2, %v1291_v21, %v1294_v22  ;;  %vm313_vm5 = vcmp.eq.s32.totalorder %v1182_v33, %v312_v25 }
  0x60   :  { %964 = vmatmul.mubr.f32.gmra.mxu1 %v58_v27  ;;  %v1318_v27 = vsel %vm301_vm3, 1.0, %v1149_v36  ;;  %vm692_vm3 = vcmask 851712  }
  0x61   :  { %966 = vmatprep.mubr.f32.mxu1 %v59_v28  ;;  %v324_v28 = vstv %s1286_s12 }
  0x62   :  { %vm325_vm6 = vcmp.eq.s32.totalorder %v1182_v33, %v324_v28  ;;  %v617_v28 = vadd.s32 4294967280, %v1182_v33 }
  0x63   :  { %v1341_v35 = vsel %vm325_vm6, 1.0, %v1149_v36  ;;  %vm706_vm6 = vcmask 982912  }
  0x64   :  { %967 = vmatmul.mubr.f32.gmra.mxu1 %v60_v29  ;;  %v369_v29 = vsel %vm356_vm4, %v368_v26, %v1305_v24 }
  0x65   :  { %969 = vmatprep.mubr.f32.mxu1 %v61_v30  ;;  %v1329_v30 = vsel %vm313_vm5, 1.0, %v1149_v36  ;;  %v370_v34 = vsel %vm358_vm8, %v369_v29, %v1318_v27  ;;  %vm699_vm5 = vcmask 917312  }
  0x66   :  { %v371_v40 = vsel %vm360_vm11, %v370_v34, %v1329_v30  ;;  %v638_v34 = vadd.s32 4294967256, %v1182_v33 }
  0x67   :  { %v372_v43 = vsel %vm362_vm12, %v371_v40, %v1341_v35 }
  0x68   :  { %970 = vmatmul.mubr.f32.gmra.mxu1 %v62_v31  ;;  %v336_v31 = vstv %s1299_s13 }
  0x69   :  { %1004 = vmatprep.mubr.f32.mxu1 %v367_v57  ;;  %vm337_vm7 = vcmp.eq.s32.totalorder %v1182_v33, %v336_v31 }
  0x6a   :  { %v1353_v42 = vsel %vm337_vm7, 1.0, %v1149_v36  ;;  %vm713_vm7 = vcmask 1048512  }
  0x6b   :  { %v373_v46 = vsel %vm364_vm13, %v372_v43, %v1353_v42 }
  0x6c   :  { %v374_v47 = vsel %vm366_vm14, %v373_v46, %v1363_v45 }
 0x10c   :  { %v1231_v58 = vpop.f32.mrf.mxu1 }
 0x10d   :  { %v462_v59 = vmul.f32 %v1231_v58, %v1231_v58 }
 0x10e   :  { %v1235_v60 = vpop.f32.mrf.mxu1 }
 0x10f   :  { %479 = vadd.xlane.f32.xlu1 %v462_v59  ;;  %v461_v56 = vmul.f32 %v1235_v60, %v1235_v60 }
 0x110   :  { %v1237_v61 = vpop.f32.mrf.mxu1 }
 0x111   :  { %v464_v57 = vmul.f32 %v1237_v61, %v1237_v61 }
 0x112   :  { %v1239_v62 = vpop.f32.mrf.mxu1 }
 0x113   :  { %v463_v63 = vmul.f32 %v1239_v62, %v1239_v62 }
 0x114   :  { %v1243_v0 = vpop.f32.mrf.mxu1 }
 0x115   :  { %481 = vadd.xlane.f32.xlu1 %v463_v63  ;;  %v466_v59 = vmul.f32 %v1243_v0, %v1243_v0 }
 0x116   :  { %v1245_v1 = vpop.f32.mrf.mxu1 }
 0x117   :  { %v465_v2 = vmul.f32 %v1245_v1, %v1245_v1 }
 0x118   :  { %v1249_v3 = vpop.f32.mrf.mxu1 }
 0x119   :  { %485 = vadd.xlane.f32.xlu1 %v465_v2  ;;  %v268_v2 = vsub.f32 1.0, %v1186_v37  ;;  %v352_v37 = vsub.f32 1.0, %v1221_v53 }
 0x11a   :  { %v1251_v4 = vpop.f32.mrf.mxu1 }
 0x11b   :  { %v467_v5 = vmul.f32 %v1251_v4, %v1251_v4 }
 0x11c   :  { %v1255_v6 = vpop.f32.mrf.mxu1 }
 0x11d   :  { %489 = vadd.xlane.f32.xlu1 %v467_v5  ;;  %v470_v63 = vmul.f32 %v1255_v6, %v1255_v6  ;;  %v304_v5 = vsub.f32 1.0, %v1201_v44 }
 0x11e   :  { %v1257_v7 = vpop.f32.mrf.mxu1 }
 0x11f   :  { %v469_v8 = vmul.f32 %v1257_v7, %v1257_v7 }
 0x120   :  { %v1261_v9 = vpop.f32.mrf.mxu1 }
 0x121   :  { %493 = vadd.xlane.f32.xlu1 %v469_v8  ;;  %v269_v8 = vsub.f32 %v268_v2, %v1291_v21 }
 0x122   :  { %v1263_v10 = vpop.f32.mrf.mxu1 }
 0x123   :  { %v471_v11 = vmul.f32 %v1263_v10, %v1263_v10 }
 0x124   :  { %v1267_v12 = vpop.f32.mrf.mxu1 }
 0x125   :  { %497 = vadd.xlane.f32.xlu1 %v471_v11 }
 0x126   :  { %v205_v13 = vpop.f32.mrf.mxu1 }
 0x127   :  { %v473_v14 = vmul.f32 %v205_v13, %v205_v13 }
 0x128   :  { %v1271_v15 = vpop.f32.mrf.mxu1 }
 0x129   :  { %501 = vadd.xlane.f32.xlu1 %v473_v14  ;;  %972 = vmatprep.subr.mxu1 %v1271_v15  ;;  %v353_v14 = vsub.f32 %v352_v37, %v1363_v45 }
 0x12a   :  { %1007 = vmatprep.subr.mxu0 %v1271_v15  ;;  %v215_v16 = vpop.f32.mrf.mxu1  ;;  %973 = vmatpush3.msra.mxu1 %v1271_v15 }
 0x12b   :  { %1008 = vmatpush3.xpose.msra.mxu0 %v1271_v15  ;;  %974 = vmatprep.subr.mxu1 %v215_v16  ;;  %v475_v17 = vmul.f32 %v215_v16, %v215_v16 }
 0x12c   :  { %1009 = vmatprep.subr.mxu0 %v215_v16  ;;  %975 = vmatpush3.msra.mxu1 %v215_v16 }
 0x12d   :  { %505 = vadd.xlane.f32.xlu1 %v475_v17  ;;  %976 = vmatprep.subr.mxu1 %v1267_v12 }
 0x12e   :  { %977 = vmatpush3.msra.mxu1 %v1267_v12 }
 0x12f   :  { %1010 = vmatpush3.xpose.msra.mxu0 %v215_v16  ;;  %978 = vmatprep.subr.mxu1 %v205_v13 }
 0x130   :  { %1011 = vmatprep.subr.mxu0 %v1267_v12  ;;  %979 = vmatpush3.msra.mxu1 %v205_v13 }
 0x131   :  { %980 = vmatprep.subr.mxu1 %v1261_v9 }
 0x132   :  { %981 = vmatpush3.msra.mxu1 %v1261_v9 }
 0x133   :  { %1012 = vmatpush3.xpose.msra.mxu0 %v1267_v12  ;;  %982 = vmatprep.subr.mxu1 %v1263_v10 }
 0x134   :  { %1013 = vmatprep.subr.mxu0 %v205_v13  ;;  %983 = vmatpush3.msra.mxu1 %v1263_v10 }
 0x135   :  { %984 = vmatprep.subr.mxu1 %v1255_v6 }
 0x136   :  { %985 = vmatpush3.msra.mxu1 %v1255_v6 }
 0x137   :  { %1014 = vmatpush3.xpose.msra.mxu0 %v205_v13  ;;  %986 = vmatprep.subr.mxu1 %v1257_v7 }
 0x138   :  { %1015 = vmatprep.subr.mxu0 %v1261_v9  ;;  %987 = vmatpush3.msra.mxu1 %v1257_v7 }
 0x139   :  { %988 = vmatprep.subr.mxu1 %v1249_v3 }
 0x13a   :  { %989 = vmatpush3.msra.mxu1 %v1249_v3 }
 0x13b   :  { %1016 = vmatpush3.xpose.msra.mxu0 %v1261_v9  ;;  %990 = vmatprep.subr.mxu1 %v1251_v4 }
 0x13c   :  { %1017 = vmatprep.subr.mxu0 %v1263_v10  ;;  %991 = vmatpush3.msra.mxu1 %v1251_v4 }
 0x13d   :  { %992 = vmatprep.subr.mxu1 %v1243_v0 }
 0x13e   :  { %993 = vmatpush3.msra.mxu1 %v1243_v0 }
 0x13f   :  { %1018 = vmatpush3.xpose.msra.mxu0 %v1263_v10  ;;  %994 = vmatprep.subr.mxu1 %v1245_v1  ;;  %v340_v10 = vsub.f32 1.0, %v1218_v52 }
 0x140   :  { %1019 = vmatprep.subr.mxu0 %v1255_v6  ;;  %995 = vmatpush3.msra.mxu1 %v1245_v1 }
 0x141   :  { %996 = vmatprep.subr.mxu1 %v1237_v61  ;;  %v341_v13 = vsub.f32 %v340_v10, %v1353_v42 }
 0x142   :  { %997 = vmatpush3.msra.mxu1 %v1237_v61 }
 0x143   :  { %1020 = vmatpush3.xpose.msra.mxu0 %v1255_v6  ;;  %998 = vmatprep.subr.mxu1 %v1239_v62  ;;  %v316_v6 = vsub.f32 1.0, %v1209_v49 }
 0x144   :  { %1021 = vmatprep.subr.mxu0 %v1257_v7  ;;  %999 = vmatpush3.msra.mxu1 %v1239_v62 }
 0x145   :  { %1000 = vmatprep.subr.mxu1 %v1231_v58  ;;  %v317_v44 = vsub.f32 %v316_v6, %v1329_v30 }
 0x146   :  { %1001 = vmatpush3.msra.mxu1 %v1231_v58 }
 0x147   :  { %1022 = vmatpush3.xpose.msra.mxu0 %v1257_v7  ;;  %1002 = vmatprep.subr.mxu1 %v1235_v60  ;;  %v328_v7 = vsub.f32 1.0, %v1215_v51 }
 0x148   :  { %1023 = vmatprep.subr.mxu0 %v1249_v3  ;;  %1003 = vmatpush3.msra.mxu1 %v1235_v60 }
 0x149   :  { %1005 = vmatmul.mubr.f32.vlgmr.msra.gmra.mxu1 %v374_v47  ;;  %v329_v51 = vsub.f32 %v328_v7, %v1341_v35  ;;  %v631_v35 = vadd.s32 4294967264, %v1182_v33  ;;  %v652_v47 = vadd.s32 4294967240, %v1182_v33  ;;  %v673_v7 = vadd.s32 4294967216, %v1182_v33 }
 0x14b   :  { %1024 = vmatpush3.xpose.msra.mxu0 %v1249_v3 }
 0x14c   :  { %1025 = vmatprep.subr.mxu0 %v1251_v4 }
 0x14f   :  { %1026 = vmatpush3.xpose.msra.mxu0 %v1251_v4  ;;  %v292_v4 = vsub.f32 1.0, %v1194_v41 }
 0x150   :  { %1027 = vmatprep.subr.mxu0 %v1243_v0 }
 0x151   :  { %v293_v11 = vsub.f32 %v292_v4, %v1305_v24  ;;  %v680_v4 = vadd.s32 4294967208, %v1182_v33 }
 0x153   :  { %1028 = vmatpush3.xpose.msra.mxu0 %v1243_v0  ;;  %v476_v0 = vmul.f32 %v1271_v15, %v1271_v15 }
 0x154   :  { %1029 = vmatprep.subr.mxu0 %v1245_v1 }
 0x157   :  { %1030 = vmatpush3.xpose.msra.mxu0 %v1245_v1 }
 0x158   :  { %1031 = vmatprep.subr.mxu0 %v1237_v61 }
 0x15b   :  { %1032 = vmatpush3.xpose.msra.mxu0 %v1237_v61  ;;  %v474_v61 = vmul.f32 %v1267_v12, %v1267_v12 }
 0x15c   :  { %1033 = vmatprep.subr.mxu0 %v1239_v62 }
 0x15f   :  { %1034 = vmatpush3.xpose.msra.mxu0 %v1239_v62  ;;  %v468_v62 = vmul.f32 %v1249_v3, %v1249_v3  ;;  %v280_v3 = vsub.f32 1.0, %v1190_v39  ;;  %v305_v39 = vsub.f32 %v304_v5, %v1318_v27  ;;  %v624_v27 = vadd.s32 4294967272, %v1182_v33 }
 0x160   :  { %1035 = vmatprep.subr.mxu0 %v1231_v58 }
 0x163   :  { %1036 = vmatpush3.xpose.msra.mxu0 %v1231_v58  ;;  %v1150_v58 = vmov 0  }
 0x164   :  { %1037 = vmatprep.subr.mxu0 %v1235_v60  ;;  %1050 = vset.pattern.permute.xlu1 %v1150_v58 }
 0x165   :  { %1051 = vset.pattern.permute.xlu0 %v1150_v58 }
 0x167   :  { %1038 = vmatpush3.xpose.msra.mxu0 %v1235_v60  ;;  %v472_v60 = vmul.f32 %v1261_v9, %v1261_v9  ;;  %v281_v9 = vsub.f32 %v280_v3, %v1294_v22  ;;  %v1434_v22 = vshrl.u32 %v256_v32, 7 }
 0x169   :  { %v375_v41 = vsel %vm354_vm2, %v269_v8, %v281_v9  ;;  %v608_v26 = vsub.s32 %v1182_v33, %v1434_v22  ;;  %v613_v29 = vsub.s32 %v610_v23, %v1434_v22  ;;  %v627_v31 = vsub.s32 %v624_v27, %v1434_v22 }
 0x16a   :  { %v376_v49 = vsel %vm356_vm4, %v375_v41, %v293_v11  ;;  %v620_v32 = vsub.s32 %v617_v28, %v1434_v22  ;;  %vm615_vm2 = vcmask 130112   ;;  %vm622_vm4 = vcmask 195712  }
 0x16b   :  { %v377_v12 = vsel %vm358_vm8, %v376_v49, %v305_v39  ;;  %v641_v46 = vsub.s32 %v638_v34, %v1434_v22  ;;  %vm629_vm8 = vcmask 261312   ;;  %v683_v39 = vsub.s32 %v680_v4, %v1434_v22 }
 0x16c   :  { %v378_v52 = vsel %vm360_vm11, %v377_v12, %v317_v44  ;;  %vm643_vm11 = vcmask 392512   ;;  %v694_v41 = vadd.s32 4294967192, %v1182_v33  ;;  %v676_v49 = vsub.s32 %v673_v7, %v1434_v22 }
 0x16d   :  { %v379_v53 = vsel %vm362_vm12, %v378_v52, %v329_v51  ;;  %vm650_vm12 = vcmask 458112   ;;  %v687_v51 = vadd.s32 4294967200, %v1182_v33 }
 0x16e   :  { %v380_v16 = vsel %vm364_vm13, %v379_v53, %v341_v13  ;;  %vm657_vm13 = vcmask 523712  }
 0x16f   :  { %v1431_v17 = vsel %vm366_vm14, %v380_v16, %v353_v14  ;;  %vm664_vm14 = vcmask 589312   ;;  %v708_v16 = vadd.s32 4294967176, %v1182_v33 }
 0x198   :  { %v480_v19 = vpop.xlane.xlu1 %479 }
 0x199   :  { %v614_v40 = vrot.slane %v480_v19, %v613_v29  ;;  %v690_v19 = vsub.s32 %v687_v51, %v1434_v22 }
 0x19e   :  { %v482_v21 = vpop.xlane.xlu1 %481 }
 0x1a2   :  { %v486_v25 = vpop.xlane.xlu1 %485 }
 0x1a6   :  { %v490_v42 = vpop.xlane.xlu1 %489 }
 0x209   :  { %v1006_v36 = vpop.f32.mrf.mxu1 }
 0x20a   :  { %v510_v1 = vmul.f32 %v1006_v36, %v1006_v36 }
 0x20b   :  { %v448_v48 = vpop.f32.mrf.mxu1 }
 0x20c   :  { %1039 = vmatprep.mubr.f32.mxu0 %v448_v48  ;;  %v509_v50 = vmul.f32 %v448_v48, %v448_v48  ;;  %v457_v54 = vsub.f32 %v448_v48, %v1006_v36  ;;  %v634_v48 = vsub.s32 %v631_v35, %v1434_v22 }
 0x20d   :  { %1040 = vmatmul.mubr.f32.vlgmr.msra.gmra.mxu0 %v1006_v36  ;;  %v621_v36 = vrot.slane %v482_v21, %v620_v32 }
 0x20e   :  { %511 = vadd.xlane.f32.xlu1 %v509_v50  ;;  %v458_v55 = vmul.f32 %v457_v54, %v457_v54  ;;  %v645_v50 = vadd.s32 4294967248, %v1182_v33 }
 0x210   :  { %459 = vadd.xlane.f32.xlu0 %v458_v55 }
 0x214   :  { %477 = vadd.xlane.f32.xlu0 %v461_v56  ;;  %v494_v56 = vpop.xlane.xlu1 %493 }
 0x218   :  { %483 = vadd.xlane.f32.xlu0 %v464_v57  ;;  %v498_v9 = vpop.xlane.xlu1 %497 }
 0x21c   :  { %487 = vadd.xlane.f32.xlu0 %v466_v59  ;;  %v655_v59 = vsub.s32 %v652_v47, %v1434_v22  ;;  %v502_v52 = vpop.xlane.xlu1 %501 }
 0x220   :  { %491 = vadd.xlane.f32.xlu0 %v468_v62  ;;  %v666_v62 = vadd.s32 4294967224, %v1182_v33  ;;  %v506_v29 = vpop.xlane.xlu1 %505 }
 0x222   :  { %v669_v3 = vsub.s32 %v666_v62, %v1434_v22 }
 0x224   :  { %495 = vadd.xlane.f32.xlu0 %v470_v63  ;;  %v635_v63 = vrot.slane %v486_v25, %v634_v48  ;;  %v711_v25 = vsub.s32 %v708_v16, %v1434_v22 }
 0x228   :  { %499 = vadd.xlane.f32.xlu0 %v472_v60  ;;  %v648_v60 = vsub.s32 %v645_v50, %v1434_v22 }
 0x22a   :  { %v649_v5 = vrot.slane %v490_v42, %v648_v60 }
 0x22c   :  { %503 = vadd.xlane.f32.xlu0 %v474_v61  ;;  %v659_v61 = vadd.s32 4294967232, %v1182_v33 }
 0x22e   :  { %v662_v6 = vsub.s32 %v659_v61, %v1434_v22 }
 0x230   :  { %507 = vadd.xlane.f32.xlu0 %v476_v0  ;;  %v663_v44 = vrot.slane %v494_v56, %v662_v6 }
 0x234   :  { %513 = vadd.xlane.f32.xlu0 %v510_v1 }
 0x299   :  { %v460_v15 = vpop.xlane.xlu0 %459 }
 0x29a   :  { %736 = vperm.xlu1 %1050, %v460_v15   ;;  %v697_v15 = vsub.s32 %v694_v41, %v1434_v22 }
 0x29d   :  { %v478_v18 = vpop.xlane.xlu0 %477 }
 0x29e   :  { %v609_v30 = vrot.slane %v478_v18, %v608_v26  ;;  %v677_v18 = vrot.slane %v498_v9, %v676_v49  ;;  %v691_v26 = vrot.slane %v502_v52, %v690_v19 }
 0x2a0   :  { %v616_v43 = vsel %vm615_vm2, %v614_v40, %v609_v30 }
 0x2a1   :  { %v484_v20 = vpop.xlane.xlu0 %483  ;;  %v623_v54 = vsel %vm622_vm4, %v621_v36, %v616_v43 }
 0x2a2   :  { %v628_v45 = vrot.slane %v484_v20, %v627_v31  ;;  %v701_v20 = vadd.s32 4294967184, %v1182_v33 }
 0x2a4   :  { %v630_v57 = vsel %vm629_vm8, %v628_v45, %v623_v54  ;;  %v704_v27 = vsub.s32 %v701_v20, %v1434_v22 }
 0x2a5   :  { %v488_v24 = vpop.xlane.xlu0 %487  ;;  %v637_v0 = vsel %vm636_vm10, %v635_v63, %v630_v57 }
 0x2a6   :  { %v642_v58 = vrot.slane %v488_v24, %v641_v46  ;;  %v705_v35 = vrot.slane %v506_v29, %v704_v27  ;;  %v512_v46 = vpop.xlane.xlu1 %511 }
 0x2a8   :  { %v644_v1 = vsel %vm643_vm11, %v642_v58, %v637_v0 }
 0x2a9   :  { %v492_v38 = vpop.xlane.xlu0 %491  ;;  %v651_v10 = vsel %vm650_vm12, %v649_v5, %v644_v1 }
 0x2aa   :  { %v656_v2 = vrot.slane %v492_v38, %v655_v59 }
 0x2ac   :  { %v658_v11 = vsel %vm657_vm13, %v656_v2, %v651_v10 }
 0x2ad   :  { %v496_v55 = vpop.xlane.xlu0 %495  ;;  %v665_v12 = vsel %vm664_vm14, %v663_v44, %v658_v11 }
 0x2ae   :  { %v670_v37 = vrot.slane %v496_v55, %v669_v3 }
 0x2b0   :  { %v672_v14 = vsel %vm671_vm15, %v670_v37, %v665_v12 }
 0x2b1   :  { %v500_v8 = vpop.xlane.xlu0 %499  ;;  %v679_v21 = vsel %vm678_vm0, %v677_v18, %v672_v14 }
 0x2b2   :  { %v684_v53 = vrot.slane %v500_v8, %v683_v39 }
 0x2b4   :  { %v686_v23 = vsel %vm685_vm1, %v684_v53, %v679_v21 }
 0x2b5   :  { %v504_v13 = vpop.xlane.xlu0 %503  ;;  %v693_v31 = vsel %vm692_vm3, %v691_v26, %v686_v23 }
 0x2b6   :  { %v698_v24 = vrot.slane %v504_v13, %v697_v15 }
 0x2b8   :  { %v700_v34 = vsel %vm699_vm5, %v698_v24, %v693_v31 }
 0x2b9   :  { %v508_v28 = vpop.xlane.xlu0 %507  ;;  %v707_v38 = vsel %vm706_vm6, %v705_v35, %v700_v34 }
 0x2ba   :  { %v712_v32 = vrot.slane %v508_v28, %v711_v25 }
 0x2bc   :  { %v714_v40 = vsel %vm713_vm7, %v712_v32, %v707_v38 }
 0x2bd   :  { %v514_v42 = vpop.xlane.xlu0 %513  ;;  %v728_v47 = vadd.f32 %v714_v40, %v512_v46 }
 0x2be   :  { %v729_v36 = vadd.f32 %v714_v40, %v514_v42 }
 0x2cd   :  { %v1041_v30 = vpop.f32.mrf.mxu0 }
 0x2ce   :  { %v731_v43 = vmul.f32 2.0, %v1041_v30 }
 0x2cf   :  { %v581_v33 = vpop.f32.mrf.mxu0 }
 0x2d0   :  { %v730_v45 = vmul.f32 2.0, %v581_v33  ;;  %v733_v22 = vsub.f32 %v729_v36, %v731_v43 }
 0x2d2   :  { %v732_v48 = vsub.f32 %v728_v47, %v730_v45 }
 0x315   :  { %v737_v50 = vpop.permute.xlu1 %736 }
 0x316   :  { %v739_v54 = vsub.f32 %v737_v50, %v732_v48  ;;  %v740_v55 = vsub.f32 %v737_v50, %v733_v22 }
 0x318   :  { %v741_v56 = vadd.f32 3.0, %v739_v54  ;;  %v742_v57 = vadd.f32 3.0, %v740_v55 }
 0x31a   :  { %v743_v58 = vmul.f32 %v741_v56, %v1431_v17  ;;  %v744_v59 = vmul.f32 %v742_v57, %v1431_v17 }
 0x31c   :  { %745 = vadd.xlane.f32.xlu0 %v743_v58 }
 0x320   :  { %747 = vadd.xlane.f32.xlu0 %v744_v59 }
 0x3a5   :  { %v746_v62 = vpop.xlane.xlu0 %745 }
 0x3a6   :  { %v750_v63 = vmul.f32 0.0078125, %v746_v62 }
 0x3a8   :  { %v752_v60 = vsub.f32 %v743_v58, %v750_v63 }
 0x3a9   :  { %v748_v61 = vpop.xlane.xlu0 %747 }
 0x3aa   :  { %v751_v0 = vmul.f32 0.0078125, %v748_v61  ;;  %v754_v1 = vmul.f32 %v752_v60, %v752_v60 }
 0x3ac   :  { %v753_v2 = vsub.f32 %v744_v59, %v751_v0  ;;  %756 = vadd.xlane.f32.xlu0 %v754_v1 }
 0x3ae   :  { %v755_v3 = vmul.f32 %v753_v2, %v753_v2 }
 0x3b0   :  { %758 = vadd.xlane.f32.xlu0 %v755_v3 }
 0x435   :  { %v757_v4 = vpop.xlane.xlu0 %756 }
 0x436   :  { %v760_v5 = vmul.f32 0.0078125, %v757_v4 }
 0x438   :  { %1052 = vrsqrt.f32 %v760_v5 }
 0x439   :  { %v759_v6 = vpop.xlane.xlu0 %758 }
 0x43a   :  { %v761_v7 = vmul.f32 0.0078125, %v759_v6 }
 0x43c   :  { %1054 = vrsqrt.f32 %v761_v7 }
 0x445   :  { %v1053_v8 = vpop.eup %1052 }
 0x446   :  { %v764_v17 = vmul.f32 %v1053_v8, %v752_v60 }
 0x448   :  { %v766_v9 = vmul.f32 30.0, %v764_v17 }
 0x449   :  { %v1055_v10 = vpop.eup %1054 }
 0x44a   :  { %v768_v11 = vadd.f32 10.0, %v766_v9  ;;  %v765_v37 = vmul.f32 %v1055_v10, %v753_v2 }
 0x44c   :  { %770 = vmax.xlane.f32.xlu1 %v768_v11  ;;  %v767_v39 = vmul.f32 30.0, %v765_v37 }
 0x44e   :  { %v769_v41 = vadd.f32 10.0, %v767_v39 }
 0x450   :  { %772 = vmax.xlane.f32.xlu0 %v769_v41 }
 0x4d5   :  { %v771_v44 = vpop.xlane.xlu1 %770 }
 0x4d6   :  { %v774_v49 = vsub.f32 %v768_v11, %v771_v44 }
 0x4d8   :  { %v776_v51 = vmul.f32 1.442695, %v774_v49 }
 0x4d9   :  { %v773_v12 = vpop.xlane.xlu0 %772 }
 0x4da   :  { %1056 = vpow2.f32 %v776_v51  ;;  %v775_v13 = vsub.f32 %v769_v41, %v773_v12 }
 0x4dc   :  { %v778_v52 = vmul.f32 1.442695, %v775_v13 }
 0x4de   :  { %1058 = vpow2.f32 %v778_v52 }
 0x4e7   :  { %v1057_v14 = vpop.eup %1056 }
 0x4e8   :  { %780 = vadd.xlane.f32.xlu0 %v1057_v14 }
 0x4eb   :  { %v1059_v53 = vpop.eup %1058 }
 0x4ec   :  { %782 = vadd.xlane.f32.xlu0 %v1059_v53 }
 0x571   :  { %v781_v15 = vpop.xlane.xlu0 %780 }
 0x572   :  { %1060 = vlog2.f32 %v781_v15 }
 0x575   :  { %v783_v16 = vpop.xlane.xlu0 %782 }
 0x576   :  { %1062 = vlog2.f32 %v783_v16 }
 0x57f   :  { %v1061_v18 = vpop.eup %1060 }
 0x580   :  { %v785_v19 = vmul.f32 0.6931472, %v1061_v18 }
 0x582   :  { %v788_v23 = vadd.f32 %v785_v19, %v771_v44 }
 0x583   :  { %v1063_v20 = vpop.eup %1062 }
 0x584   :  { %v787_v21 = vmul.f32 0.6931472, %v1063_v20 }
 0x586   :  { %v789_v24 = vadd.f32 %v787_v21, %v773_v12 }
 0x588   :  { %v790_v25 = vadd.f32 %v789_v24, %v788_v23 }
 0x58a   :  { %v791_v26 = vrot.slane %v790_v25, 4 }
 0x58c   :  { %v792_v27 = vadd.f32 %v791_v26, %v790_v25 }
 0x58e   :  { %v793_v28 = vrot.slane %v792_v27, 2 }
 0x590   :  { %v794_v29 = vadd.f32 %v793_v28, %v792_v27 }
 0x592   :  { %v795_v30 = vrot.slane %v794_v29, 1 }
 0x594   :  { %v796_v31 = vadd.f32 %v795_v30, %v794_v29 }
 0x596   :  { %v798_v34 = vmul.f32 0.125, %v796_v31 }
 0x598   :  { %800 = vst.msk [vmem:[#allocation10] sm:$0x1] %vm799_vm9, %v798_v34 }
 0x599   :  { %1127 = shalt.err (!%p1124_p5)
}
 0x59a   :  { %810 = dma.vmem_to_hbm [thread:$0]  %s808_s16, 16, %s1476_s3, [#allocation7]  }
 0x59b   :  { %1142 = dma.done.wait [#allocation7], 16  }
 0x59c   :  { %1143 = vsyncadd [#allocation7], 4294967280 }
 0x59d   :  { %814 = vsyncpa [#allocation6], 1 }
 0x59e   :  { %815 = vsyncpa [#allocation9], 1 }
 0x59f   :  { %816 = vsyncpa [#allocation7], 1 }

</bundles_post_ra>
